<compile_context>
chip_gen: v6e
topology: v6e:2x2x1
jax: 0.10.0
libtpu: 0.0.40
codegen_flags: <defaults>
</compile_context>

<pallas_src>
import math

import jax
import jax.numpy as jnp
from jax.experimental import pallas as pl
from jax.experimental.pallas import tpu as pltpu


def _iou_loss_kernel(r_ref, l_ref, inter_out, union_out, inter_acc, union_acc):
    """Streams (n_rows, TD) tiles; accumulates inter and union lane-wise."""
    k = pl.program_id(1)  # reduction (lane-tile) axis

    @pl.when(k == 0)
    def _init():
        inter_acc[...] = jnp.zeros_like(inter_acc)
        union_acc[...] = jnp.zeros_like(union_acc)

    x = r_ref[...].astype(jnp.float32)
    # sigmoid(x) = 0.5 * (tanh(x / 2) + 1): single EUP op + cheap VPU ops.
    r = 0.5 * (jnp.tanh(0.5 * x) + 1.0)
    l = l_ref[...].astype(jnp.float32)

    # Two read-modify-write accumulators (union = rsum + lsum merged); all
    # cross-lane (XLU) reductions are deferred to the finalize branch.
    inter_acc[...] += r * l
    union_acc[...] += r + l

    @pl.when(k == pl.num_programs(1) - 1)
    def _finalize():
        inter_out[...] = jnp.sum(inter_acc[...], axis=1, keepdims=True)
        union_out[...] = jnp.sum(union_acc[...], axis=1, keepdims=True)


def _round_up(x, m):
    return ((x + m - 1) // m) * m


def _tpu_vmem_capacity_bytes():
    try:
        cap = getattr(pltpu.get_tpu_info(), "vmem_capacity_bytes", None)
        if cap:
            return int(cap)
    except Exception:
        pass
    return 64 * 1024 * 1024  # conservative fallback (v7x per-TC physical VMEM)


def iou_loss(result, label, tile_d=None):
    """Pallas TPU implementation of IOUloss.forward(result, label)."""
    num = label.shape[0]
    d = math.prod(result.shape[1:]) if result.ndim > 1 else 1

    rflat = result.reshape(num, d)
    # Binary {0,1} labels are exact in bf16; halves label HBM bytes.
    # TODO(synk): if labels can be soft (non-binary) floats, keep them f32 here.
    lflat = label.reshape(num, d).astype(jnp.bfloat16)

    # --- sublane densification: make the row dim a multiple of 8 -------------
    s = 8 // math.gcd(num, 8)  # sub-rows per sample
    n_rows = num * s

    # --- tile width from per-generation VMEM budget ---------------------------
    capacity = _tpu_vmem_capacity_bytes()
    budget = int(capacity * 0.4)  # working-set budget with headroom
    # Per lane column: 2x double-buffered inputs (4B f32 + 2B bf16) + 2x 4B acc.
    per_lane = 20 * n_rows
    d_row_min = -(-d // s)  # ceil(d / s) lanes per sub-row
    if tile_d is None:
        td_cap = max(128, (budget // per_lane) // 128 * 128)
        # TODO(synk): for very large batch (td_cap pinned at 128) switch to
        # fixed-width accumulators so TD stays decoupled from n_rows.
        td = min(td_cap, 32768, _round_up(d_row_min, 128))
    else:
        assert tile_d % 128 == 0, "tile_d must be a multiple of 128"
        td = tile_d

    # --- lane padding + megacore split ----------------------------------------
    n_blocks = -(-d_row_min // td)
    n_par = 2 if n_blocks >= 2 else 1  # both TensorCores on v7x; harmless elsewhere
    n_blocks = _round_up(n_blocks, n_par)
    n_inner = n_blocks // n_par
    d_row = n_blocks * td
    d_pad = s * d_row

    if d_pad != d:
        # Padded logits -> sigmoid exactly 0; padded labels are 0: all sums are
        # unchanged, and the lane-dense double-buffered pipeline is preserved.
        rflat = jnp.pad(rflat, ((0, 0), (0, d_pad - d)), constant_values=-1e9)
        lflat = jnp.pad(lflat, ((0, 0), (0, d_pad - d)), constant_values=0)
    r2 = rflat.reshape(n_rows, d_row)
    l2 = lflat.reshape(n_rows, d_row)

    footprint = per_lane * td + 2 * 4 * n_par * n_rows
    vmem_limit = int(min(int(capacity * 0.9), footprint + (16 << 20)))

    inter_p, union_p = pl.pallas_call(
        _iou_loss_kernel,
        out_shape=(
            jax.ShapeDtypeStruct((n_par, n_rows, 1), jnp.float32),
            jax.ShapeDtypeStruct((n_par, n_rows, 1), jnp.float32),
        ),
        grid_spec=pltpu.PrefetchScalarGridSpec(
            num_scalar_prefetch=0,
            grid=(n_par, n_inner),
            in_specs=[
                pl.BlockSpec((n_rows, td), lambda p, k: (0, p * n_inner + k)),
                pl.BlockSpec((n_rows, td), lambda p, k: (0, p * n_inner + k)),
            ],
            out_specs=(
                pl.BlockSpec((None, n_rows, 1), lambda p, k: (p, 0, 0)),
                pl.BlockSpec((None, n_rows, 1), lambda p, k: (p, 0, 0)),
            ),
            scratch_shapes=[
                pltpu.VMEM((n_rows, td), jnp.float32),  # inter accumulator
                pltpu.VMEM((n_rows, td), jnp.float32),  # union (r + l) accumulator
            ],
        ),
        compiler_params=pltpu.CompilerParams(
            dimension_semantics=("parallel", "arbitrary"),
            vmem_limit_bytes=vmem_limit,
        ),
        cost_estimate=pl.CostEstimate(
            flops=int(6 * n_rows * d_row),
            transcendentals=int(n_rows * d_row),
            bytes_accessed=int(n_rows * d_row * 6 + 2 * n_par * n_rows * 4),
        ),
    )(r2, l2)

    # Tiny epilogue: combine per-core / per-subrow partials and form the loss.
    inter = inter_p.sum(axis=0)[:, 0].reshape(num, s).sum(axis=1)
    union = union_p.sum(axis=0)[:, 0].reshape(num, s).sum(axis=1)
    score = (inter + 1.0) / (union - inter + 1.0)
    return 1.0 - jnp.sum(score) / num


def _iou_loss_ref(result, label):
    # Pure-JAX reference mirroring the PyTorch module exactly.
    num = label.shape[0]
    r = jax.nn.sigmoid(result.astype(jnp.float32)).reshape(num, -1)
    l = label.astype(jnp.float32).reshape(num, -1)
    inter = jnp.sum(r * l, axis=1)
    score = (inter + 1.0) / (jnp.sum(r, axis=1) + jnp.sum(l, axis=1) - inter + 1.0)
    return 1.0 - jnp.sum(score) / num


if __name__ == "__main__":
    key = jax.random.PRNGKey(0)
    k1, k2, k3, k4 = jax.random.split(key, 4)

    # Small NCHW segmentation-style inputs.
    N, C, H, W = 2, 4, 16, 16
    result = jax.random.normal(k1, (N, C, H, W), dtype=jnp.float32)
    label = (jax.random.uniform(k2, (N, C, H, W)) > 0.5).astype(jnp.float32)

    ref = _iou_loss_ref(result, label)

    # Default tile selection (single grid step at this small D).
    out = jax.block_until_ready(iou_loss(result, label))
    assert jnp.allclose(out, ref, atol=1e-5, rtol=1e-5), (out, ref)

    # Multi-tile path: exercises the accumulator + 2-way parallel grid split.
    out_tiled = jax.block_until_ready(iou_loss(result, label, tile_d=128))
    assert jnp.allclose(out_tiled, ref, atol=1e-5, rtol=1e-5), (out_tiled, ref)

    # Non-128-aligned D and odd batch: exercises wrapper padding + densify.
    N2, C2, H2, W2 = 3, 1, 5, 7
    result2 = jax.random.normal(k3, (N2, C2, H2, W2), dtype=jnp.float32)
    label2 = (jax.random.uniform(k4, (N2, C2, H2, W2)) > 0.5).astype(jnp.float32)
    ref2 = _iou_loss_ref(result2, label2)
    out2 = jax.block_until_ready(iou_loss(result2, label2))
    assert jnp.allclose(out2, ref2, atol=1e-5, rtol=1e-5), (out2, ref2)

    print("KERNEL_OK")
</pallas_src>

<mosaic_0001>
module attributes {stable_mosaic.version = 11 : i64} {
  func.func @_iou_loss_kernel(%arg0: i32, %arg1: i32, %arg2: memref<8x256xf32, #tpu.memory_space<vmem>>, %arg3: memref<8x256xbf16, #tpu.memory_space<vmem>>, %arg4: memref<1x8x1xf32, #tpu.memory_space<vmem>>, %arg5: memref<1x8x1xf32, #tpu.memory_space<vmem>>, %arg6: memref<8x256xf32, #tpu.memory_space<vmem>>, %arg7: memref<8x256xf32, #tpu.memory_space<vmem>>) attributes {dimension_semantics = [#tpu.dimension_semantics<parallel>, #tpu.dimension_semantics<arbitrary>], iteration_bounds = array<i64: 1, 1>, scalar_prefetch = 0 : i64, scratch_operands = 2 : i64, tpu.core_type = #tpu.core_type<tc>, window_params = [{transform_indices = @transform_0, window_bounds = array<i64: 8, 256>}, {transform_indices = @transform_1, window_bounds = array<i64: 8, 256>}, {transform_indices = @transform_2, window_bounds = array<i64: 1, 8, 1>}, {transform_indices = @transform_3, window_bounds = array<i64: 1, 8, 1>}]} {
    %c0_i32 = arith.constant 0 : i32
    %0 = arith.cmpi eq, %arg1, %c0_i32 : i32
    %1 = arith.extui %0 : i1 to i32
    %c0_i32_0 = arith.constant 0 : i32
    %2 = arith.cmpi ne, %1, %c0_i32_0 : i32
    scf.if %2 {
      %cst_16 = arith.constant 0.000000e+00 : f32
      %24 = vector.broadcast %cst_16 : f32 to vector<8x256xf32>
      %c0_17 = arith.constant 0 : index
      %c0_18 = arith.constant 0 : index
      %25 = vector.load %arg6[%c0_17, %c0_18] : memref<8x256xf32, #tpu.memory_space<vmem>>, vector<8x256xf32>
      tpu.vector_store %arg6[%c0_17, %c0_18], %24 {strides = array<i32>} : memref<8x256xf32, #tpu.memory_space<vmem>>, vector<8x256xf32>,
      %cst_19 = arith.constant 0.000000e+00 : f32
      %26 = vector.broadcast %cst_19 : f32 to vector<8x256xf32>
      %c0_20 = arith.constant 0 : index
      %c0_21 = arith.constant 0 : index
      %27 = vector.load %arg7[%c0_20, %c0_21] : memref<8x256xf32, #tpu.memory_space<vmem>>, vector<8x256xf32>
      tpu.vector_store %arg7[%c0_20, %c0_21], %26 {strides = array<i32>} : memref<8x256xf32, #tpu.memory_space<vmem>>, vector<8x256xf32>,
    } else {
    }
    %c0 = arith.constant 0 : index
    %c0_1 = arith.constant 0 : index
    %3 = vector.load %arg2[%c0, %c0_1] : memref<8x256xf32, #tpu.memory_space<vmem>>, vector<8x256xf32>
    %cst = arith.constant 5.000000e-01 : f32
    %4 = vector.broadcast %cst : f32 to vector<8x256xf32>
    %5 = arith.mulf %4, %3 : vector<8x256xf32>
    %6 = math.tanh %5 : vector<8x256xf32>
    %cst_2 = arith.constant 1.000000e+00 : f32
    %7 = vector.broadcast %cst_2 : f32 to vector<8x256xf32>
    %8 = arith.addf %6, %7 : vector<8x256xf32>
    %cst_3 = arith.constant 5.000000e-01 : f32
    %9 = vector.broadcast %cst_3 : f32 to vector<8x256xf32>
    %10 = arith.mulf %9, %8 : vector<8x256xf32>
    %c0_4 = arith.constant 0 : index
    %c0_5 = arith.constant 0 : index
    %11 = vector.load %arg3[%c0_4, %c0_5] : memref<8x256xbf16, #tpu.memory_space<vmem>>, vector<8x256xbf16>
    %12 = arith.extf %11 : vector<8x256xbf16> to vector<8x256xf32>
    %c0_6 = arith.constant 0 : index
    %c0_7 = arith.constant 0 : index
    %13 = vector.load %arg6[%c0_6, %c0_7] : memref<8x256xf32, #tpu.memory_space<vmem>>, vector<8x256xf32>
    %14 = arith.mulf %10, %12 : vector<8x256xf32>
    %15 = arith.addf %13, %14 : vector<8x256xf32>
    %c0_8 = arith.constant 0 : index
    %c0_9 = arith.constant 0 : index
    %16 = vector.load %arg6[%c0_8, %c0_9] : memref<8x256xf32, #tpu.memory_space<vmem>>, vector<8x256xf32>
    tpu.vector_store %arg6[%c0_8, %c0_9], %15 {strides = array<i32>} : memref<8x256xf32, #tpu.memory_space<vmem>>, vector<8x256xf32>,
    %c0_10 = arith.constant 0 : index
    %c0_11 = arith.constant 0 : index
    %17 = vector.load %arg7[%c0_10, %c0_11] : memref<8x256xf32, #tpu.memory_space<vmem>>, vector<8x256xf32>
    %18 = arith.addf %10, %12 : vector<8x256xf32>
    %19 = arith.addf %17, %18 : vector<8x256xf32>
    %c0_12 = arith.constant 0 : index
    %c0_13 = arith.constant 0 : index
    %20 = vector.load %arg7[%c0_12, %c0_13] : memref<8x256xf32, #tpu.memory_space<vmem>>, vector<8x256xf32>
    tpu.vector_store %arg7[%c0_12, %c0_13], %19 {strides = array<i32>} : memref<8x256xf32, #tpu.memory_space<vmem>>, vector<8x256xf32>,
    %c0_i32_14 = arith.constant 0 : i32
    %21 = arith.cmpi eq, %arg1, %c0_i32_14 : i32
    %22 = arith.extui %21 : i1 to i32
    %c0_i32_15 = arith.constant 0 : i32
    %23 = arith.cmpi ne, %22, %c0_i32_15 : i32
    scf.if %23 {
      %c0_16 = arith.constant 0 : index
      %c0_17 = arith.constant 0 : index
      %24 = vector.load %arg6[%c0_16, %c0_17] : memref<8x256xf32, #tpu.memory_space<vmem>>, vector<8x256xf32>
      %cst_18 = arith.constant dense<0.000000e+00> : vector<8xf32>
      %25 = vector.multi_reduction <add>, %24, %cst_18 [1] : vector<8x256xf32> to vector<8xf32>
      %26 = vector.shape_cast %25 : vector<8xf32> to vector<8x1xf32>
      %c0_19 = arith.constant 0 : index
      %c0_20 = arith.constant 0 : index
      %c0_21 = arith.constant 0 : index
      %27 = vector.load %arg4[%c0_19, %c0_20, %c0_21] : memref<1x8x1xf32, #tpu.memory_space<vmem>>, vector<1x8x1xf32>
      %28 = vector.shape_cast %27 : vector<1x8x1xf32> to vector<8x1xf32>
      %29 = vector.shape_cast %26 : vector<8x1xf32> to vector<1x8x1xf32>
      tpu.vector_store %arg4[%c0_19, %c0_20, %c0_21], %29 {strides = array<i32>} : memref<1x8x1xf32, #tpu.memory_space<vmem>>, vector<1x8x1xf32>,
      %c0_22 = arith.constant 0 : index
      %c0_23 = arith.constant 0 : index
      %30 = vector.load %arg7[%c0_22, %c0_23] : memref<8x256xf32, #tpu.memory_space<vmem>>, vector<8x256xf32>
      %cst_24 = arith.constant dense<0.000000e+00> : vector<8xf32>
      %31 = vector.multi_reduction <add>, %30, %cst_24 [1] : vector<8x256xf32> to vector<8xf32>
      %32 = vector.shape_cast %31 : vector<8xf32> to vector<8x1xf32>
      %c0_25 = arith.constant 0 : index
      %c0_26 = arith.constant 0 : index
      %c0_27 = arith.constant 0 : index
      %33 = vector.load %arg5[%c0_25, %c0_26, %c0_27] : memref<1x8x1xf32, #tpu.memory_space<vmem>>, vector<1x8x1xf32>
      %34 = vector.shape_cast %33 : vector<1x8x1xf32> to vector<8x1xf32>
      %35 = vector.shape_cast %32 : vector<8x1xf32> to vector<1x8x1xf32>
      tpu.vector_store %arg5[%c0_25, %c0_26, %c0_27], %35 {strides = array<i32>} : memref<1x8x1xf32, #tpu.memory_space<vmem>>, vector<1x8x1xf32>,
    } else {
    }
    return
  }
  func.func @transform_0(%arg0: i32, %arg1: i32) -> (i32, i32) {
    %c1_i32 = arith.constant 1 : i32
    %0 = arith.muli %arg0, %c1_i32 : i32
    %1 = arith.addi %0, %arg1 : i32
    %c0_i32 = arith.constant 0 : i32
    %c0_i32_0 = arith.constant 0 : i32
    return %c0_i32, %1 : i32, i32
  }
  func.func @transform_1(%arg0: i32, %arg1: i32) -> (i32, i32) {
    %c1_i32 = arith.constant 1 : i32
    %0 = arith.muli %arg0, %c1_i32 : i32
    %1 = arith.addi %0, %arg1 : i32
    %c0_i32 = arith.constant 0 : i32
    %c0_i32_0 = arith.constant 0 : i32
    return %c0_i32, %1 : i32, i32
  }
  func.func @transform_2(%arg0: i32, %arg1: i32) -> (i32, i32, i32) {
    %c0_i32 = arith.constant 0 : i32
    %c0_i32_0 = arith.constant 0 : i32
    %c0_i32_1 = arith.constant 0 : i32
    return %arg0, %c0_i32, %c0_i32_0 : i32, i32, i32
  }
  func.func @transform_3(%arg0: i32, %arg1: i32) -> (i32, i32, i32) {
    %c0_i32 = arith.constant 0 : i32
    %c0_i32_0 = arith.constant 0 : i32
    %c0_i32_1 = arith.constant 0 : i32
    return %arg0, %c0_i32, %c0_i32_0 : i32, i32, i32
  }
}

</mosaic_0001>

<bundles_post_ra>
// kernel: tpu_custom_call.1
= control target key start
LH: loop header
LB: loop body
LE: loop exit
PB: predicated region body
PF: predicated region fallthrough
CT: control target
= control target key end

     0   :  { %9 = vsyncpa [#allocation5], 0  ;;  %s196_s0 = inlined_call_operand.hbm [shape: f32[8,256], index: 0, kind: input, shape index: {}]   ;;  %s197_s1 = inlined_call_operand.hbm [shape: bf16[8,256], index: 1, kind: input, shape index: {}]   ;;  %s198_s2 = inlined_call_operand.vmem [shape: f32[1,8,1], index: 2, kind: output, shape index: {0}]   ;;  %s199_s3 = inlined_call_operand.vmem [shape: f32[1,8,1], index: 3, kind: output, shape index: {1}]  }
   0x1   :  { %10 = vsyncpa [#allocation7], 0  ;;  %s162_s12 = smov [#allocation4]   ;;  %s163_s14 = smov [#allocation6]  }
   0x2   :  { %s21_s13 = sshll.u32 %s162_s12, 4  ;;  %s35_s15 = sshll.u32 %s163_s14, 4  ;;  %s22_s13 = int_to_ptr.vmem [resolvable:$true] %s21_s13  ;;  %s36_s15 = int_to_ptr.vmem [resolvable:$true] %s35_s15 }
   0x3   :  { %s126_s16 = scalar_lea.vmem %s22_s13, 256  ;;  %p131_p1 = scmp.lt.s32.totalorder %s22_s13, %s22_s13 }
   0x4   :  { %p127_p0 = scmp.ne.s32.totalorder %s22_s13, %s126_s16  ;;  %p132_p2 = scmp.lt.s32.totalorder %s126_s16, %s126_s16 }
   0x6   :  { %p133_p3 = por %p132_p2, %p131_p1 }
   0x8   :  { %p134_p4 = pnand %p133_p3, %p127_p0 }
   0xa   :  { %137 = shalt.err (!%p134_p4)
}
   0xb   :  { %24 = dma.hbm_to_vmem [thread:$0]  %s196_s0, 256, %s22_s13, [#allocation5]  }
   0xc   :  { %s146_s19 = scalar_lea.vmem %s36_s15, 128  ;;  %p151_p6 = scmp.lt.s32.totalorder %s36_s15, %s36_s15 }
   0xd   :  { %p147_p5 = scmp.ne.s32.totalorder %s36_s15, %s146_s19  ;;  %p152_p7 = scmp.lt.s32.totalorder %s146_s19, %s146_s19 }
   0xf   :  { %p153_p8 = por %p152_p7, %p151_p6 }
  0x11   :  { %p154_p9 = pnand %p153_p8, %p147_p5 }
  0x13   :  { %157 = shalt.err (!%p154_p9)
}
  0x14   :  { %38 = dma.hbm_to_vmem [thread:$0]  %s197_s1, 128, %s36_s15, [#allocation7]  }
  0x15   :  { %158 = dma.done.wait [#allocation5], 256  }
  0x16   :  { %159 = vsyncadd [#allocation5], 4294967040 }
  0x17   :  { %160 = dma.done.wait [#allocation7], 128  }
  0x18   :  { %161 = vsyncadd [#allocation7], 4294967168  ;;  %v57_v0 = vld [vmem:[#allocation4] sm:$0xff]  ;;  %v58_v1 = vld [vmem:[#allocation4 + $0x8] sm:$0xff]  ;;  %vm94_vm0 = vcmask 7168  }
  0x19   :  { %v59_v2 = vmul.f32 0.5, %v57_v0  ;;  %v60_v3 = vmul.f32 0.5, %v58_v1  ;;  %v67_v4 = vld [vmem:[#allocation6] sm:$0xff] }
  0x1a   :  { %v68_v8 = vunpack.c.l.bf16 %v67_v4  ;;  %v69_v10 = vunpack.c.h.bf16 %v67_v4 }
  0x1b   :  { %114 = vtanh.f32 %v59_v2 }
  0x1c   :  { %116 = vtanh.f32 %v60_v3 }
  0x28   :  { %v115_v5 = vpop.eup %114 }
  0x29   :  { %v117_v6 = vpop.eup %116  ;;  %v63_v7 = vadd.f32 1.0, %v115_v5 }
  0x2a   :  { %v64_v9 = vadd.f32 1.0, %v117_v6 }
  0x2b   :  { %v65_v11 = vmul.f32 0.5, %v63_v7 }
  0x2c   :  { %v66_v12 = vmul.f32 0.5, %v64_v9 }
  0x2d   :  { %v72_v13 = vmul.f32 %v68_v8, %v65_v11  ;;  %v80_v15 = vadd.f32 %v68_v8, %v65_v11 }
  0x2e   :  { %v73_v14 = vmul.f32 %v69_v10, %v66_v12  ;;  %v81_v16 = vadd.f32 %v69_v10, %v66_v12 }
  0x30   :  { %v91_v17 = vadd.f32 %v73_v14, %v72_v13  ;;  %v98_v18 = vadd.f32 %v81_v16, %v80_v15 }
  0x32   :  { %92 = vadd.xlane.f32.xlu0 %v91_v17 }
  0x36   :  { %99 = vadd.xlane.f32.xlu0 %v98_v18 }
  0xbb   :  { %v93_v19 = vpop.xlane.xlu0 %92 }
  0xbc   :  { %95 = vst.msk [vmem:[%s198_s2] sm:$0xff] %vm94_vm0, %v93_v19 }
  0xbf   :  { %v100_v20 = vpop.xlane.xlu0 %99 }
  0xc0   :  { %101 = vst.msk [vmem:[%s199_s3] sm:$0xff] %vm94_vm0, %v100_v20 }
  0xc1   :  { %110 = vsyncpa [#allocation5], 1 }
  0xc2   :  { %111 = vsyncpa [#allocation7], 1 }

</bundles_post_ra>
